<compile_context>
chip_gen: v6e
topology: v6e:2x2x1
jax: 0.10.0
libtpu: 0.0.40
codegen_flags: <defaults>
</compile_context>

<pallas_src>
import functools

import jax
import jax.numpy as jnp
from jax.experimental import pallas as pl
from jax.experimental.pallas import tpu as pltpu


def _round_up(x: int, m: int) -> int:
    return ((x + m - 1) // m) * m


def _mf_loss_kernel(pred_ref, adj_ref, omega_ref, out_ref, acc_ref, *,
                    tm, m_total, grid_m, inner, omega_is_mask, has_pad):
    c = pl.program_id(0)                 # core-slice index ("parallel")
    j = pl.program_id(1)                 # step within the slice ("arbitrary")
    g = c * inner + j                    # global row-block index

    @pl.when(j == 0)
    def _init():
        acc_ref[...] = jnp.zeros_like(acc_ref)

    pred = pred_ref[...].astype(jnp.float32)
    adj = adj_ref[...].astype(jnp.float32)
    if omega_is_mask:
        # 0/1 observation mask: select beats cast + multiply (fewer VPU ops).
        diff = jnp.where(omega_ref[...] != 0, pred - adj, jnp.float32(0.0))
    else:
        # General (float-valued) omega: keep exact `data * omega` semantics.
        diff = (pred - adj) * omega_ref[...].astype(jnp.float32)

    n = diff.shape[1]

    def _accumulate(d):
        sq = d * d                                        # (tm, n)
        # Pure-VPU fold into vreg-sublane shape; the single XLU reduce is
        # deferred to the final step of this core slice.
        acc_ref[...] += sq.reshape(tm // 8, 8, n).sum(axis=0)   # (8, n)

    ragged = (m_total % tm) != 0
    if ragged:
        # Mask out-of-range rows only on the last (partial) row tile; all
        # full tiles take the unmasked fast path.
        @pl.when(g == grid_m - 1)
        def _last_tile():
            row = g * tm + jax.lax.broadcasted_iota(jnp.int32, diff.shape, 0)
            _accumulate(jnp.where(row < m_total, diff, jnp.float32(0.0)))

        @pl.when(g < grid_m - 1)
        def _full_tile():
            _accumulate(diff)
    elif has_pad:
        # Grid padded to a rectangle: duplicate (clamped) blocks are skipped.
        @pl.when(g < grid_m)
        def _valid_tile():
            _accumulate(diff)
    else:
        _accumulate(diff)

    @pl.when(j == pl.num_programs(1) - 1)
    def _finalize():
        out_ref[...] = jnp.sum(acc_ref[...], keepdims=True).astype(out_ref.dtype)


def mf_loss(user_mat, item_mat, adj_predicted, adj, omega,
            reg_user: float, reg_item: float, *, max_tile_rows: int | None = None):
    """Pallas implementation of MFLoss.forward. Returns a scalar f32."""
    assert adj_predicted.shape == adj.shape == omega.shape
    assert user_mat.ndim == 2 and item_mat.ndim == 2
    m, n = adj.shape

    def _isize(a):
        return jnp.dtype(a.dtype).itemsize

    # --- chip-aware VMEM budgeting -----------------------------------------
    try:
        vmem_physical = int(pltpu.get_tpu_info().vmem_capacity_bytes)
    except Exception:
        vmem_physical = 64 << 20  # conservative (v7x per-TensorCore)

    n_pad = _round_up(n, 128)
    stream_row_bytes = n_pad * (_isize(adj_predicted) + _isize(adj) + _isize(omega))

    if vmem_physical >= (96 << 20):
        # v5e / v6e: 128 MiB VMEM, tiny resident state -> be generous.
        stream_budget = vmem_physical // 2
    else:
        # v7x: 64 MiB; leave headroom for compiler-internal f32 temporaries.
        stream_budget = vmem_physical // 4

    tm_cap = max(8, (stream_budget // 2) // max(1, stream_row_bytes))
    tm_cap = max(8, min(4096, (tm_cap // 8) * 8))
    tm = min(tm_cap, _round_up(m, 8))
    if max_tile_rows is not None:
        tm = min(tm, max(8, (int(max_tile_rows) // 8) * 8))
    grid_m = pl.cdiv(m, tm)

    acc_bytes = 8 * n_pad * 4
    temp_bytes = 4 * tm * n_pad * 4          # slack for elementwise temporaries
    needed = 2 * tm * stream_row_bytes + acc_bytes + temp_bytes + (2 << 20)
    if needed > (vmem_physical * 7) // 8:
        # TODO(synk): add a column (N) tiling axis for extremely wide adjacency
        # matrices instead of failing here.
        raise ValueError("MFLoss: adjacency row tile does not fit VMEM; "
                         "N is too wide for the current single-column-tile kernel")
    vmem_limit = int(min(max(needed, 16 << 20), (vmem_physical * 7) // 8))

    # --- grid: leading size-2 'parallel' axis for the v7x 2-TensorCore split.
    # On 1-TC chips (v5e/v6e) it simply runs serially and stays correct.
    nc = 2 if grid_m >= 2 else 1
    inner = pl.cdiv(grid_m, nc)
    has_pad = nc * inner != grid_m

    if has_pad:
        # Clamp the (single) padded block onto the last real block; the kernel
        # skips the duplicate visit via the `g < grid_m` guard.
        row_map = lambda c, j: (jnp.minimum(c * inner + j, grid_m - 1), 0)
    else:
        row_map = lambda c, j: (c * inner + j, 0)

    omega_is_mask = bool(omega.dtype == jnp.bool_
                         or jnp.issubdtype(omega.dtype, jnp.integer))

    kernel = functools.partial(
        _mf_loss_kernel,
        tm=tm, m_total=m, grid_m=grid_m, inner=inner,
        omega_is_mask=omega_is_mask, has_pad=has_pad)

    cost = pl.CostEstimate(
        flops=int(4 * m * n),
        transcendentals=0,
        bytes_accessed=int(m * n * (_isize(adj_predicted) + _isize(adj)
                                    + _isize(omega)) + nc * 4))

    partials = pl.pallas_call(
        kernel,
        out_shape=jax.ShapeDtypeStruct((nc, 1), jnp.float32),
        grid_spec=pltpu.PrefetchScalarGridSpec(
            num_scalar_prefetch=0,
            grid=(nc, inner),
            in_specs=[
                pl.BlockSpec((tm, n), row_map),   # adj_predicted (streamed)
                pl.BlockSpec((tm, n), row_map),   # adj           (streamed)
                pl.BlockSpec((tm, n), row_map),   # omega         (streamed)
            ],
            out_specs=pl.BlockSpec((1, 1), lambda c, j: (c, 0)),
            scratch_shapes=[pltpu.VMEM((8, n), jnp.float32)],
        ),
        compiler_params=pltpu.CompilerParams(
            dimension_semantics=("parallel", "arbitrary"),
            vmem_limit_bytes=vmem_limit),
        cost_estimate=cost,
    )(adj_predicted, adj, omega)

    # Tiny finalization in plain XLA: sum the per-core partials, sqrt, and add
    # the factor-matrix regularization norms (kept out of the kernel on purpose).
    residual_ss = jnp.sum(partials)
    fro = lambda x: jnp.sqrt(jnp.sum(jnp.square(x.astype(jnp.float32))))
    return (0.5 * jnp.sqrt(residual_ss)
            + (float(reg_user) * 0.5) * fro(user_mat)
            + (float(reg_item) * 0.5) * fro(item_mat))


def mf_loss_ref(user_mat, item_mat, adj_predicted, adj, omega,
                reg_user: float, reg_item: float):
    fro = lambda x: jnp.sqrt(jnp.sum(x * x))
    return (0.5 * fro((adj_predicted - adj) * omega)
            + (reg_user / 2.0) * fro(user_mat)
            + (reg_item / 2.0) * fro(item_mat))


def _run_case(key, n_users, n_items, hidden, reg_user, reg_item,
              omega_mask=True, max_tile_rows=None):
    k_u, k_i, k_p, k_a, k_o = jax.random.split(key, 5)
    user_mat = jax.random.normal(k_u, (n_users, hidden), dtype=jnp.float32)
    item_mat = jax.random.normal(k_i, (n_items, hidden), dtype=jnp.float32)
    adj_pred = jax.random.normal(k_p, (n_users, n_items), dtype=jnp.float32)
    adj = jax.random.normal(k_a, (n_users, n_items), dtype=jnp.float32)
    if omega_mask:
        # 0/1 observation mask shipped as int8 to cut HBM traffic.
        omega = (jax.random.uniform(k_o, (n_users, n_items)) < 0.5).astype(jnp.int8)
        omega_f = omega.astype(jnp.float32)
    else:
        # General real-valued omega weights (non-binary).
        omega = jax.random.uniform(k_o, (n_users, n_items), dtype=jnp.float32,
                                   minval=0.0, maxval=2.0)
        omega_f = omega

    out = mf_loss(user_mat, item_mat, adj_pred, adj, omega, reg_user, reg_item,
                  max_tile_rows=max_tile_rows)
    out = jax.block_until_ready(out)
    ref = mf_loss_ref(user_mat, item_mat, adj_pred, adj, omega_f,
                      reg_user, reg_item)
    assert jnp.allclose(out, ref, rtol=1e-5, atol=1e-5), (out, ref)


if __name__ == "__main__":
    root = jax.random.PRNGKey(0)
    k1, k2, k3, k4 = jax.random.split(root, 4)

    # 1) Basic case: int8 0/1 mask, single full row tile.
    _run_case(k1, n_users=16, n_items=32, hidden=8,
              reg_user=0.1, reg_item=0.2, omega_mask=True)

    # 2) Float-valued omega weights + ragged (partial) last row tile.
    _run_case(k2, n_users=20, n_items=160, hidden=8,
              reg_user=0.3, reg_item=0.05, omega_mask=False)

    # 3) Multi-tile stream with the 2-way parallel split + ragged last tile.
    _run_case(k3, n_users=50, n_items=256, hidden=16,
              reg_user=0.2, reg_item=0.1, omega_mask=True, max_tile_rows=16)

    # 4) Odd number of row tiles (exercises the clamped/padded grid path).
    _run_case(k4, n_users=48, n_items=256, hidden=16,
              reg_user=0.15, reg_item=0.25, omega_mask=False, max_tile_rows=16)

    print("KERNEL_OK")
</pallas_src>

<mosaic_0001>
module attributes {stable_mosaic.version = 11 : i64} {
  func.func @_mf_loss_kernel(%arg0: i32, %arg1: i32, %arg2: memref<16x32xf32, #tpu.memory_space<vmem>>, %arg3: memref<16x32xf32, #tpu.memory_space<vmem>>, %arg4: memref<16x32xi8, #tpu.memory_space<vmem>>, %arg5: memref<1x1xf32, #tpu.memory_space<vmem>>, %arg6: memref<8x32xf32, #tpu.memory_space<vmem>>) attributes {dimension_semantics = [#tpu.dimension_semantics<parallel>, #tpu.dimension_semantics<arbitrary>], iteration_bounds = array<i64: 1, 1>, scalar_prefetch = 0 : i64, scratch_operands = 1 : i64, tpu.core_type = #tpu.core_type<tc>, window_params = [{transform_indices = @transform_0, window_bounds = array<i64: 16, 32>}, {transform_indices = @transform_1, window_bounds = array<i64: 16, 32>}, {transform_indices = @transform_2, window_bounds = array<i64: 16, 32>}, {transform_indices = @transform_3, window_bounds = array<i64: 1, 1>}]} {
    %c0_i32 = arith.constant 0 : i32
    %0 = arith.cmpi eq, %arg1, %c0_i32 : i32
    %1 = arith.extui %0 : i1 to i32
    %c0_i32_0 = arith.constant 0 : i32
    %2 = arith.cmpi ne, %1, %c0_i32_0 : i32
    scf.if %2 {
      %cst_13 = arith.constant 0.000000e+00 : f32
      %20 = vector.broadcast %cst_13 : f32 to vector<8x32xf32>
      %c0_14 = arith.constant 0 : index
      %c0_15 = arith.constant 0 : index
      %21 = vector.load %arg6[%c0_14, %c0_15] : memref<8x32xf32, #tpu.memory_space<vmem>>, vector<8x32xf32>
      tpu.vector_store %arg6[%c0_14, %c0_15], %20 {strides = array<i32>} : memref<8x32xf32, #tpu.memory_space<vmem>>, vector<8x32xf32>,
    } else {
    }
    %c0 = arith.constant 0 : index
    %c0_1 = arith.constant 0 : index
    %3 = vector.load %arg2[%c0, %c0_1] : memref<16x32xf32, #tpu.memory_space<vmem>>, vector<16x32xf32>
    %c0_2 = arith.constant 0 : index
    %c0_3 = arith.constant 0 : index
    %4 = vector.load %arg3[%c0_2, %c0_3] : memref<16x32xf32, #tpu.memory_space<vmem>>, vector<16x32xf32>
    %c0_4 = arith.constant 0 : index
    %c0_5 = arith.constant 0 : index
    %5 = vector.load %arg4[%c0_4, %c0_5] : memref<16x32xi8, #tpu.memory_space<vmem>>, vector<16x32xi8>
    %c0_i8 = arith.constant 0 : i8
    %6 = vector.broadcast %c0_i8 : i8 to vector<16x32xi8>
    %7 = arith.cmpi ne, %5, %6 : vector<16x32xi8>
    %8 = arith.subf %3, %4 : vector<16x32xf32>
    %cst = arith.constant 0.000000e+00 : f32
    %9 = vector.broadcast %cst : f32 to vector<16x32xf32>
    %10 = arith.select %7, %8, %9 : vector<16x32xi1>, vector<16x32xf32>
    %11 = arith.mulf %10, %10 : vector<16x32xf32>
    %c0_6 = arith.constant 0 : index
    %c0_7 = arith.constant 0 : index
    %12 = vector.load %arg6[%c0_6, %c0_7] : memref<8x32xf32, #tpu.memory_space<vmem>>, vector<8x32xf32>
    %13 = vector.shape_cast %11 : vector<16x32xf32> to vector<2x8x32xf32>
    %cst_8 = arith.constant dense<0.000000e+00> : vector<8x32xf32>
    %14 = vector.multi_reduction <add>, %13, %cst_8 [0] : vector<2x8x32xf32> to vector<8x32xf32>
    %15 = arith.addf %12, %14 : vector<8x32xf32>
    %c0_9 = arith.constant 0 : index
    %c0_10 = arith.constant 0 : index
    %16 = vector.load %arg6[%c0_9, %c0_10] : memref<8x32xf32, #tpu.memory_space<vmem>>, vector<8x32xf32>
    tpu.vector_store %arg6[%c0_9, %c0_10], %15 {strides = array<i32>} : memref<8x32xf32, #tpu.memory_space<vmem>>, vector<8x32xf32>,
    %c0_i32_11 = arith.constant 0 : i32
    %17 = arith.cmpi eq, %arg1, %c0_i32_11 : i32
    %18 = arith.extui %17 : i1 to i32
    %c0_i32_12 = arith.constant 0 : i32
    %19 = arith.cmpi ne, %18, %c0_i32_12 : i32
    scf.if %19 {
      %c0_13 = arith.constant 0 : index
      %c0_14 = arith.constant 0 : index
      %20 = vector.load %arg6[%c0_13, %c0_14] : memref<8x32xf32, #tpu.memory_space<vmem>>, vector<8x32xf32>
      %21 = vector.shape_cast %20 : vector<8x32xf32> to vector<1x8x32xf32>
      %cst_15 = arith.constant dense<0.000000e+00> : vector<1xf32>
      %22 = vector.multi_reduction <add>, %21, %cst_15 [1, 2] : vector<1x8x32xf32> to vector<1xf32>
      %23 = vector.shape_cast %22 : vector<1xf32> to vector<1x1x1xf32>
      %24 = vector.extract %23[0, 0, 0] : f32 from vector<1x1x1xf32>
      %25 = vector.broadcast %24 : f32 to vector<1x1xf32>
      %c0_16 = arith.constant 0 : index
      %c0_17 = arith.constant 0 : index
      %26 = vector.load %arg5[%c0_16, %c0_17] : memref<1x1xf32, #tpu.memory_space<vmem>>, vector<1x1xf32>
      tpu.vector_store %arg5[%c0_16, %c0_17], %25 {strides = array<i32>} : memref<1x1xf32, #tpu.memory_space<vmem>>, vector<1x1xf32>,
    } else {
    }
    return
  }
  func.func @transform_0(%arg0: i32, %arg1: i32) -> (i32, i32) {
    %c1_i32 = arith.constant 1 : i32
    %0 = arith.muli %arg0, %c1_i32 : i32
    %1 = arith.addi %0, %arg1 : i32
    %c0_i32 = arith.constant 0 : i32
    %c0_i32_0 = arith.constant 0 : i32
    return %1, %c0_i32 : i32, i32
  }
  func.func @transform_1(%arg0: i32, %arg1: i32) -> (i32, i32) {
    %c1_i32 = arith.constant 1 : i32
    %0 = arith.muli %arg0, %c1_i32 : i32
    %1 = arith.addi %0, %arg1 : i32
    %c0_i32 = arith.constant 0 : i32
    %c0_i32_0 = arith.constant 0 : i32
    return %1, %c0_i32 : i32, i32
  }
  func.func @transform_2(%arg0: i32, %arg1: i32) -> (i32, i32) {
    %c1_i32 = arith.constant 1 : i32
    %0 = arith.muli %arg0, %c1_i32 : i32
    %1 = arith.addi %0, %arg1 : i32
    %c0_i32 = arith.constant 0 : i32
    %c0_i32_0 = arith.constant 0 : i32
    return %1, %c0_i32 : i32, i32
  }
  func.func @transform_3(%arg0: i32, %arg1: i32) -> (i32, i32) {
    %c0_i32 = arith.constant 0 : i32
    %c0_i32_0 = arith.constant 0 : i32
    return %arg0, %c0_i32 : i32, i32
  }
}

</mosaic_0001>

<bundles_post_ra>
// kernel: tpu_custom_call.1
= control target key start
LH: loop header
LB: loop body
LE: loop exit
PB: predicated region body
PF: predicated region fallthrough
CT: control target
= control target key end

     0   :  { %8 = vsyncpa [#allocation4], 0  ;;  %s287_s0 = inlined_call_operand.hbm [shape: f32[16,32], index: 0, kind: input, shape index: {}]   ;;  %s288_s1 = inlined_call_operand.hbm [shape: f32[16,32], index: 1, kind: input, shape index: {}]   ;;  %s289_s2 = inlined_call_operand.hbm [shape: s8[16,32], index: 2, kind: input, shape index: {}]   ;;  %s290_s3 = inlined_call_operand.hbm [shape: f32[1,1], index: 3, kind: output, shape index: {}]  }
   0x1   :  { %9 = vsyncpa [#allocation7], 0 }
   0x2   :  { %10 = vsyncpa [#allocation5], 0  ;;  %s240_s12 = smov [#allocation6]   ;;  %s241_s14 = smov [#allocation3]  }
   0x3   :  { %s36_s13 = sshll.u32 %s240_s12, 4  ;;  %s20_s15 = sshll.u32 %s241_s14, 4  ;;  %s37_s13 = int_to_ptr.vmem [resolvable:$true] %s36_s13  ;;  %s21_s15 = int_to_ptr.vmem [resolvable:$true] %s20_s15 }
   0x4   :  { %s162_s16 = scalar_lea.vmem %s37_s13, 256  ;;  %p167_p1 = scmp.lt.s32.totalorder %s37_s13, %s37_s13 }
   0x5   :  { %p163_p0 = scmp.ne.s32.totalorder %s37_s13, %s162_s16  ;;  %p168_p2 = scmp.lt.s32.totalorder %s162_s16, %s162_s16 }
   0x7   :  { %p169_p3 = por %p168_p2, %p167_p1 }
   0x9   :  { %p170_p4 = pnand %p169_p3, %p163_p0 }
   0xb   :  { %173 = shalt.err (!%p170_p4)
}
   0xc   :  { %s242_s17 = smov 128   ;;  %s243_s18 = smov 8  }
   0xd   :  { %42 = dma.hbm_to_vmem [thread:$0]  %s288_s1, 256, %s37_s13, [#allocation7], %s242_s17, %s242_s17, %s243_s18  }
   0xe   :  { %s182_s21 = scalar_lea.vmem %s21_s15, 256  ;;  %p187_p6 = scmp.lt.s32.totalorder %s21_s15, %s21_s15 }
   0xf   :  { %p183_p5 = scmp.ne.s32.totalorder %s21_s15, %s182_s21  ;;  %p188_p7 = scmp.lt.s32.totalorder %s182_s21, %s182_s21 }
  0x11   :  { %p189_p8 = por %p188_p7, %p187_p6 }
  0x13   :  { %p190_p9 = pnand %p189_p8, %p183_p5 }
  0x15   :  { %193 = shalt.err (!%p190_p9)
}
  0x16   :  { %26 = dma.hbm_to_vmem [thread:$0]  %s287_s0, 256, %s21_s15, [#allocation4], %s242_s17, %s242_s17, %s243_s18  }
  0x17   :  { %s244_s24 = smov [#allocation8]  }
  0x18   :  { %s52_s25 = sshll.u32 %s244_s24, 4  ;;  %s53_s25 = int_to_ptr.vmem [resolvable:$true] %s52_s25 }
  0x19   :  { %s202_s26 = scalar_lea.vmem %s53_s25, 64  ;;  %p207_p11 = scmp.lt.s32.totalorder %s53_s25, %s53_s25 }
  0x1a   :  { %p203_p10 = scmp.ne.s32.totalorder %s53_s25, %s202_s26  ;;  %p208_p12 = scmp.lt.s32.totalorder %s202_s26, %s202_s26 }
  0x1c   :  { %p209_p13 = por %p208_p12, %p207_p11 }
  0x1e   :  { %p210_p0 = pnand %p209_p13, %p203_p10 }
  0x20   :  { %213 = shalt.err (!%p210_p0)
}
  0x21   :  { %s245_s1 = smov 32   ;;  %s246_s27 = smov 2  }
  0x22   :  { %58 = dma.hbm_to_vmem [thread:$0]  %s289_s2, 64, %s53_s25, [#allocation7], %s245_s1, %s245_s1, %s246_s27  }
  0x23   :  { %234 = dma.done.wait [#allocation4], 256  }
  0x24   :  { %235 = vsyncadd [#allocation4], 4294967040 }
  0x25   :  { %236 = dma.done.wait [#allocation7], 320  }
  0x26   :  { %237 = vsyncadd [#allocation7], 4294966976  ;;  %vm80_vm0 = vcmask 261120   ;;  %v247_v0 = vmov 0.0   ;;  %v82_v1 = vld [vmem:[#allocation3] sm:$0xff]  ;;  %v83_v2 = vld [vmem:[#allocation3 + $0x8] sm:$0xff] }
  0x27   :  { %81 = vst.msk [vmem:[#allocation2] sm:$0xff] %vm80_vm0, %v247_v0  ;;  %v84_v3 = vld [vmem:[#allocation6] sm:$0xff]  ;;  %v85_v4 = vld [vmem:[#allocation6 + $0x8] sm:$0xff]  ;;  %v86_v5 = vld [vmem:[#allocation8] sm:$0x3]  ;;  %v248_v9 = vmov 0  }
  0x28   :  { %v87_v6 = vld [vmem:[#allocation8 + $0x2] sm:$0x3]  ;;  %vm88_vm1 = vnez %v86_v5  ;;  %v90_v7 = vsub.f32 %v82_v1, %v84_v3  ;;  %v91_v8 = vsub.f32 %v83_v2, %v85_v4  ;;  %s249_s0 = smov [#allocation9]   ;;  %vm124_vm5 = vcmask 0  }
  0x29   :  { %vm89_vm2 = vnez %v87_v6  ;;  %v92_v10 = vsel %vm88_vm1, 16843009, %v248_v9  ;;  %s132_s2 = sshll.u32 %s249_s0, 4  ;;  %s133_s2 = int_to_ptr.vmem [resolvable:$true] %s132_s2 }
  0x2a   :  { %v93_v11 = vsel %vm89_vm2, 16843009, %v248_v9  ;;  %v94_v12 = vunpack.c.0.s8 %v92_v10  ;;  %s214_s4 = scalar_lea.vmem %s133_s2, 16  ;;  %s218_s5 = scalar_lea.vmem %s133_s2, 32 }
  0x2b   :  { %v95_v13 = vunpack.c.0.s8 %v93_v11  ;;  %p215_p1 = scmp.ne.s32.totalorder %s133_s2, %s214_s4  ;;  %p219_p2 = scmp.lt.s32.totalorder %s133_s2, %s133_s2 }
  0x2c   :  { %vm96_vm3 = vcmp.ne.s32.totalorder %v94_v12, 0  ;;  %p220_p3 = scmp.lt.s32.totalorder %s218_s5, %s214_s4 }
  0x2d   :  { %vm97_vm4 = vcmp.ne.s32.totalorder %v95_v13, 0  ;;  %v98_v14 = vsel %vm96_vm3, %v90_v7, 0.0 }
  0x2e   :  { %v99_v15 = vsel %vm97_vm4, %v91_v8, 0.0  ;;  %v100_v16 = vmul.f32 %v98_v14, %v98_v14  ;;  %v102_v18 = vld [vmem:[#allocation2] sm:$0xff]  ;;  %p221_p4 = por %p220_p3, %p219_p2 }
  0x2f   :  { %v101_v17 = vmul.f32 %v99_v15, %v99_v15 }
  0x30   :  { %v104_v19 = vsel %vm80_vm0, %v100_v16, 0.0  ;;  %p222_p5 = pnand %p221_p4, %p215_p1 }
  0x31   :  { %v105_v20 = vsel %vm80_vm0, %v101_v17, 0.0 }
  0x32   :  { %v106_v21 = vadd.f32 %v105_v20, %v104_v19 }
  0x34   :  { %v107_v22 = vadd.f32 %v106_v21, %v102_v18 }
  0x36   :  { %108 = vst.msk [vmem:[#allocation2] sm:$0xff] %vm80_vm0, %v107_v22 }
  0x3d   :  { %v112_v23 = vld [vmem:[#allocation2] sm:$0xff] }
  0x3e   :  { %v113_v24 = vsel %vm80_vm0, %v112_v23, 0.0 }
  0x3f   :  { %114 = vadd.xlane.f32.xlu0 %v113_v24 }
  0xc8   :  { %v115_v25 = vpop.xlane.xlu0 %114 }
  0xc9   :  { %v116_v26 = vrot.slane %v115_v25, 4 }
  0xcb   :  { %v117_v27 = vadd.f32 %v116_v26, %v115_v25 }
  0xcd   :  { %v118_v28 = vrot.slane %v117_v27, 2 }
  0xcf   :  { %v119_v29 = vadd.f32 %v118_v28, %v117_v27 }
  0xd1   :  { %v120_v30 = vrot.slane %v119_v29, 1 }
  0xd3   :  { %v121_v31 = vadd.f32 %v120_v30, %v119_v29 }
  0xd5   :  { %142 = vpush %v121_v31 }
 0x106   :  { %s143_s30 = spop %142 }
 0x107   :  { %v123_v32 = vstv %s143_s30 }
 0x108   :  { %125 = vst.msk [vmem:[#allocation9] sm:$0x1] %vm124_vm5, %v123_v32 }
 0x109   :  { %225 = shalt.err (!%p222_p5)
}
 0x10a   :  { %135 = dma.vmem_to_hbm [thread:$0]  %s133_s2, 16, %s290_s3, [#allocation5]  }
 0x10b   :  { %238 = dma.done.wait [#allocation5], 16  }
 0x10c   :  { %239 = vsyncadd [#allocation5], 4294967280 }
 0x10d   :  { %139 = vsyncpa [#allocation4], 1 }
 0x10e   :  { %140 = vsyncpa [#allocation7], 1 }
 0x10f   :  { %141 = vsyncpa [#allocation5], 1 }

</bundles_post_ra>
